<compile_context>
chip_gen: v7x
topology: tpu7x:2x2x1
jax: 0.10.0
libtpu: 0.0.40
codegen_flags: <defaults>
</compile_context>

<pallas_src>
import functools

import jax
import jax.numpy as jnp
from jax import lax
from jax.experimental import pallas as pl
from jax.experimental.pallas import tpu as pltpu

CIN, COUT, H, W, K, DOUT = 4, 8, 16, 16, 3, 10
HW = H * W                 # 256 = 2 * 128  (tile-aligned lane count per sample)
CKK = CIN * K * K          # 36
DOUT_PAD = 128             # lane-dense output slab; sliced back to DOUT outside


def _batch_forward_kernel(xc_ref, wc_ref, bc_ref, wl_ref, bl_ref, o_ref, *, bt):
    """All `bt` replicas (samples) of one batch tile in a single grid step.

    xc_ref: (CKK, bt*HW)      im2col columns, lane dim = bt*256 (multiple of 128)
    wc_ref: (COUT, CKK)       conv weight slab
    bc_ref: (COUT, 1)         conv bias
    wl_ref: (COUT, DOUT_PAD)  linear weight (transposed, zero-padded to 128)
    bl_ref: (1, DOUT_PAD)     linear bias   (zero-padded to 128)
    o_ref : (bt, DOUT_PAD)    lane-dense output slab
    """
    # Conv as ONE lane-dense matmul: [COUT, CKK] @ [CKK, bt*HW].
    conv = jnp.dot(wc_ref[...], xc_ref[...],
                   preferred_element_type=jnp.float32)        # (COUT, bt*HW)
    conv = jnp.maximum(conv + bc_ref[...], 0.0)               # bias + ReLU

    # Global average pool, batched: split lanes into (bt, 256) and reduce the
    # tile-aligned 256 axis once for the whole tile.
    pooled = jnp.mean(conv.reshape(COUT, bt, HW), axis=-1)    # (COUT, bt)

    # Linear layer, batched: [bt, COUT] @ [COUT, DOUT_PAD] (contraction on
    # dim 0 of both operands), then bias.  Columns >= DOUT are zero.
    out = lax.dot_general(pooled, wl_ref[...],
                          (((0,), (0,)), ((), ())),
                          preferred_element_type=jnp.float32)  # (bt, DOUT_PAD)
    o_ref[...] = out + bl_ref[...]


def _im2col(x):
    """(N, CIN, H, W) -> (CIN*K*K, N*H*W), row order (cin, ky, kx),
    column order (n, h, w).  Matches wc.reshape(COUT, CIN*K*K)."""
    n = x.shape[0]
    x_pad = jnp.pad(x, ((0, 0), (0, 0), (1, 1), (1, 1)))
    patches = [x_pad[:, :, dy:dy + H, dx:dx + W]
               for dy in range(K) for dx in range(K)]          # each (N,CIN,H,W)
    cols = jnp.stack(patches, axis=2)                          # (N, CIN, K*K, H, W)
    cols = cols.reshape(n, CKK, HW)                            # (N, 36, 256)
    cols = jnp.transpose(cols, (1, 0, 2))                      # (36, N, 256)
    return cols.reshape(CKK, n * HW)                           # (36, N*256)


def privacy_wrapper_forward(x, params, num_replicas):
    """Forward pass of PrivacyWrapper in training mode.

    x: (N, CIN, H, W) with N == num_replicas (the wrapper enforces this).
    All weight-sharing replicas are evaluated in one (or a few) grid steps;
    the per-replica outputs are concatenated along the batch axis.
    """
    if x.shape[0] != num_replicas:
        raise ValueError(
            f"num_replicas ({num_replicas}) must be equal to the batch size "
            f"({x.shape[0]}).")
    wc, bc, wl, bl = params
    n = x.shape[0]

    # Batch-tile size: whole batch in one step for the shipped use case
    # (num_replicas == batch size, typically small).  For very large batches
    # tile at 128 samples/step (block ~= 4.6 MB, safe under v5e's 16 MiB /
    # v6e-v7x's 32 MiB default scoped VMEM with double buffering).
    bt = n if (n <= 128 or n % 128 != 0) else 128
    grid = (n // bt,)

    # Layout plumbing in the wrapper (lane-dense DMA + contiguous slabs).
    xc = _im2col(x)                                            # (36, N*256)
    wc_r = wc.reshape(COUT, CKK)                               # (8, 36)
    bc_r = bc.reshape(COUT, 1)                                 # (8, 1)
    wl_r = jnp.pad(wl.T, ((0, 0), (0, DOUT_PAD - DOUT)))       # (8, 128)
    bl_r = jnp.pad(bl.reshape(1, DOUT), ((0, 0), (0, DOUT_PAD - DOUT)))

    out = pl.pallas_call(
        functools.partial(_batch_forward_kernel, bt=bt),
        out_shape=jax.ShapeDtypeStruct((n, DOUT_PAD), jnp.float32),
        grid_spec=pltpu.PrefetchScalarGridSpec(
            num_scalar_prefetch=0,
            grid=grid,
            in_specs=[
                pl.BlockSpec((CKK, bt * HW), lambda i: (0, i)),
                pl.BlockSpec((COUT, CKK), lambda i: (0, 0)),
                pl.BlockSpec((COUT, 1), lambda i: (0, 0)),
                pl.BlockSpec((COUT, DOUT_PAD), lambda i: (0, 0)),
                pl.BlockSpec((1, DOUT_PAD), lambda i: (0, 0)),
            ],
            out_specs=pl.BlockSpec((bt, DOUT_PAD), lambda i: (i, 0)),
        ),
        compiler_params=pltpu.CompilerParams(
            # Replica/batch axis is fully independent -> parallel (2 TCs on
            # v7x; no-op on v5e/v6e).
            dimension_semantics=("parallel",)),
    )(xc, wc_r, bc_r, wl_r, bl_r)

    # torch.cat(y_pred) over per-replica outputs; drop the lane padding.
    return out[:, :DOUT]


class PrivacyWrapper:
    """Minimal JAX port of deepee.PrivacyWrapper (forward path only)."""

    # TODO(synk): clip_and_accumulate / noise_gradient / prepare_next_batch act
    # on per-replica *gradients* (backward-time state machine + RNG noise);
    # they are not part of the forward pass and are not implemented here.

    def __init__(self, params, num_replicas, L2_clip, noise_multiplier):
        self.params = params
        self.num_replicas = num_replicas
        self.L2_clip = L2_clip
        self.noise_multiplier = noise_multiplier
        self.training = True

    def __call__(self, x):
        # In eval mode the wrapper calls the single wrapped model on the full
        # batch; since all replicas share weights the result is identical, so
        # both paths use the same batched kernel.
        return privacy_wrapper_forward(x, self.params, self.num_replicas)


def _init_params(key):
    k1, k2, k3, k4 = jax.random.split(key, 4)
    wc = jax.random.normal(k1, (COUT, CIN, K, K), jnp.float32) * 0.1
    bc = jax.random.normal(k2, (COUT,), jnp.float32) * 0.1
    wl = jax.random.normal(k3, (DOUT, COUT), jnp.float32) * 0.1
    bl = jax.random.normal(k4, (DOUT,), jnp.float32) * 0.1
    return wc, bc, wl, bl


def _ref_forward(x, params):
    wc, bc, wl, bl = params
    y = lax.conv_general_dilated(
        x, wc, window_strides=(1, 1), padding=((1, 1), (1, 1)),
        dimension_numbers=("NCHW", "OIHW", "NCHW"))
    y = y + bc[None, :, None, None]
    y = jnp.maximum(y, 0.0)
    p = jnp.mean(y, axis=(2, 3))
    return p @ wl.T + bl[None, :]


if __name__ == "__main__":
    key = jax.random.PRNGKey(0)
    kx, kp = jax.random.split(key)
    num_replicas = 2                       # == batch size, as required
    x = jax.random.normal(kx, (num_replicas, CIN, H, W), jnp.float32)
    params = _init_params(kp)

    model = PrivacyWrapper(params, num_replicas=num_replicas,
                           L2_clip=1.0, noise_multiplier=1.0)
    y = model(x)
    y = jax.block_until_ready(y)

    y_ref = jax.block_until_ready(_ref_forward(x, params))
    assert y.shape == (num_replicas, DOUT)
    assert jnp.allclose(y, y_ref, rtol=2e-3, atol=2e-3), (y, y_ref)
    print("KERNEL_OK")
</pallas_src>

<mosaic_0001>
module attributes {stable_mosaic.version = 11 : i64} {
  func.func @_batch_forward_kernel(%arg0: i32, %arg1: memref<36x512xf32, #tpu.memory_space<vmem>>, %arg2: memref<8x36xf32, #tpu.memory_space<vmem>>, %arg3: memref<8x1xf32, #tpu.memory_space<vmem>>, %arg4: memref<8x128xf32, #tpu.memory_space<vmem>>, %arg5: memref<1x128xf32, #tpu.memory_space<vmem>>, %arg6: memref<2x128xf32, #tpu.memory_space<vmem>>) attributes {dimension_semantics = [#tpu.dimension_semantics<parallel>], iteration_bounds = array<i64: 1>, scalar_prefetch = 0 : i64, scratch_operands = 0 : i64, tpu.core_type = #tpu.core_type<tc>, window_params = [{transform_indices = @transform_0, window_bounds = array<i64: 36, 512>}, {pipeline_mode = #tpu.pipeline_mode<synchronous>, transform_indices = @transform_1, window_bounds = array<i64: 8, 36>}, {pipeline_mode = #tpu.pipeline_mode<synchronous>, transform_indices = @transform_2, window_bounds = array<i64: 8, 1>}, {pipeline_mode = #tpu.pipeline_mode<synchronous>, transform_indices = @transform_3, window_bounds = array<i64: 8, 128>}, {pipeline_mode = #tpu.pipeline_mode<synchronous>, transform_indices = @transform_4, window_bounds = array<i64: 1, 128>}, {transform_indices = @transform_5, window_bounds = array<i64: 2, 128>}]} {
    %c0 = arith.constant 0 : index
    %c0_0 = arith.constant 0 : index
    %0 = vector.load %arg2[%c0, %c0_0] : memref<8x36xf32, #tpu.memory_space<vmem>>, vector<8x36xf32>
    %c0_1 = arith.constant 0 : index
    %c0_2 = arith.constant 0 : index
    %1 = vector.load %arg1[%c0_1, %c0_2] : memref<36x512xf32, #tpu.memory_space<vmem>>, vector<36x512xf32>
    %cst = arith.constant dense<0.000000e+00> : vector<8x512xf32>
    %2 = tpu.matmul %0, %1, %cst {dimension_numbers = #tpu.dot_dimension_numbers<[1], [0], [0], [1], [0, 0, 1, 1], [], []>} : vector<8x36xf32>, vector<36x512xf32>, vector<8x512xf32> -> vector<8x512xf32>
    %c0_3 = arith.constant 0 : index
    %c0_4 = arith.constant 0 : index
    %3 = vector.load %arg3[%c0_3, %c0_4] : memref<8x1xf32, #tpu.memory_space<vmem>>, vector<8x1xf32>
    %4 = vector.broadcast %3 : vector<8x1xf32> to vector<8x512xf32>
    %5 = arith.addf %2, %4 : vector<8x512xf32>
    %cst_5 = arith.constant 0.000000e+00 : f32
    %6 = vector.broadcast %cst_5 : f32 to vector<8x512xf32>
    %7 = arith.maximumf %5, %6 : vector<8x512xf32>
    %8 = vector.shape_cast %7 : vector<8x512xf32> to vector<8x2x256xf32>
    %cst_6 = arith.constant dense<0.000000e+00> : vector<8x2xf32>
    %9 = vector.multi_reduction <add>, %8, %cst_6 [2] : vector<8x2x256xf32> to vector<8x2xf32>
    %cst_7 = arith.constant 2.560000e+02 : f32
    %10 = vector.broadcast %cst_7 : f32 to vector<8x2xf32>
    %11 = arith.divf %9, %10 : vector<8x2xf32>
    %c0_8 = arith.constant 0 : index
    %c0_9 = arith.constant 0 : index
    %12 = vector.load %arg4[%c0_8, %c0_9] : memref<8x128xf32, #tpu.memory_space<vmem>>, vector<8x128xf32>
    %cst_10 = arith.constant dense<0.000000e+00> : vector<2x128xf32>
    %13 = tpu.matmul %11, %12, %cst_10 {dimension_numbers = #tpu.dot_dimension_numbers<[0], [0], [1], [1], [0, 1, 1, 1], [], []>} : vector<8x2xf32>, vector<8x128xf32>, vector<2x128xf32> -> vector<2x128xf32>
    %c0_11 = arith.constant 0 : index
    %c0_12 = arith.constant 0 : index
    %14 = vector.load %arg5[%c0_11, %c0_12] : memref<1x128xf32, #tpu.memory_space<vmem>>, vector<1x128xf32>
    %15 = vector.broadcast %14 : vector<1x128xf32> to vector<2x128xf32>
    %16 = arith.addf %13, %15 : vector<2x128xf32>
    %c0_13 = arith.constant 0 : index
    %c0_14 = arith.constant 0 : index
    %17 = vector.load %arg6[%c0_13, %c0_14] : memref<2x128xf32, #tpu.memory_space<vmem>>, vector<2x128xf32>
    tpu.vector_store %arg6[%c0_13, %c0_14], %16 {strides = array<i32>} : memref<2x128xf32, #tpu.memory_space<vmem>>, vector<2x128xf32>,
    return
  }
  func.func @transform_0(%arg0: i32) -> (i32, i32) {
    %c0_i32 = arith.constant 0 : i32
    %c0_i32_0 = arith.constant 0 : i32
    return %c0_i32, %arg0 : i32, i32
  }
  func.func @transform_1(%arg0: i32) -> (i32, i32) {
    %c0_i32 = arith.constant 0 : i32
    %c0_i32_0 = arith.constant 0 : i32
    %c0_i32_1 = arith.constant 0 : i32
    return %c0_i32, %c0_i32_0 : i32, i32
  }
  func.func @transform_2(%arg0: i32) -> (i32, i32) {
    %c0_i32 = arith.constant 0 : i32
    %c0_i32_0 = arith.constant 0 : i32
    %c0_i32_1 = arith.constant 0 : i32
    return %c0_i32, %c0_i32_0 : i32, i32
  }
  func.func @transform_3(%arg0: i32) -> (i32, i32) {
    %c0_i32 = arith.constant 0 : i32
    %c0_i32_0 = arith.constant 0 : i32
    %c0_i32_1 = arith.constant 0 : i32
    return %c0_i32, %c0_i32_0 : i32, i32
  }
  func.func @transform_4(%arg0: i32) -> (i32, i32) {
    %c0_i32 = arith.constant 0 : i32
    %c0_i32_0 = arith.constant 0 : i32
    %c0_i32_1 = arith.constant 0 : i32
    return %c0_i32, %c0_i32_0 : i32, i32
  }
  func.func @transform_5(%arg0: i32) -> (i32, i32) {
    %c0_i32 = arith.constant 0 : i32
    %c0_i32_0 = arith.constant 0 : i32
    return %arg0, %c0_i32 : i32, i32
  }
}

</mosaic_0001>

<bundles_post_ra>
// kernel: tpu_custom_call.1
= control target key start
LH: loop header
LB: loop body
LE: loop exit
PB: predicated region body
PF: predicated region fallthrough
CT: control target
= control target key end

     0   :  { %10 = vsyncpa [#allocation3], 0  ;;  %s800_s0 = inlined_call_operand.hbm [shape: f32[36,512], index: 0, kind: input, shape index: {}]   ;;  %s801_s1 = inlined_call_operand.vmem [shape: f32[8,36], index: 1, kind: input, shape index: {}]   ;;  %s802_s2 = inlined_call_operand.vmem [shape: f32[8,1], index: 2, kind: input, shape index: {}]   ;;  %s803_s3 = inlined_call_operand.vmem [shape: f32[8,128], index: 3, kind: input, shape index: {}]   ;;  %s804_s4 = inlined_call_operand.vmem [shape: f32[1,128], index: 4, kind: input, shape index: {}]   ;;  %s805_s5 = inlined_call_operand.hbm [shape: f32[2,128], index: 5, kind: output, shape index: {}]  }
   0x1   :  { %11 = vsyncpa [#allocation4], 0  ;;  %s683_s18 = smov [#allocation2]   ;;  %s635_s22 = scalar_lea.hbm %s800_s0, 2560 }
   0x2   :  { %s17_s19 = sshll.u32 %s683_s18, 4  ;;  %p636_p0 = scmp.ne.s32.totalorder %s800_s0, %s635_s22  ;;  %s18_s19 = int_to_ptr.vmem [resolvable:$true] %s17_s19 }
   0x3   :  { %p639_p1 = scmp.lt.u32.totalorder %s635_s22, %s800_s0 }
   0x5   :  { %p641_p2 = pnand %p639_p1, %p636_p0 }
   0x7   :  { %644 = shalt.err (!%p641_p2)
}
   0x8   :  { %s645_s27 = scalar_lea.vmem %s18_s19, 2560  ;;  %p650_p4 = scmp.lt.s32.totalorder %s18_s19, %s18_s19 }
   0x9   :  { %p646_p3 = scmp.ne.s32.totalorder %s18_s19, %s645_s27  ;;  %p651_p5 = scmp.lt.s32.totalorder %s645_s27, %s645_s27 }
   0xb   :  { %p652_p6 = por %p651_p5, %p650_p4 }
   0xd   :  { %p653_p7 = pnand %p652_p6, %p646_p3 }
   0xf   :  { %656 = shalt.err (!%p653_p7)
}
  0x10   :  { %s684_s28 = smov 512   ;;  %s685_s29 = smov 32  }
  0x11   :  { %23 = dma.hbm_to_vmem [thread:$0]  %s800_s0, 2560, %s18_s19, [#allocation3], %s684_s28, %s684_s28, %s685_s29  }
  0x12   :  { %679 = dma.done.wait [#allocation3], 2560  }
  0x13   :  { %680 = vsyncadd [#allocation3], 4294964736  ;;  %v686_v0 = vmov 0.0   ;;  %v687_v1 = vmov 0   ;;  %v37_v2 = vld [vmem:[#allocation2 + $0x8] sm:$0xff]  ;;  %v39_v4 = vld [vmem:[#allocation2 + $0x18] sm:$0xff]  ;;  %v229_v32 = vlaneseq }
  0x14   :  { %143 = vmatprep.mubr.f32.mxu0 %v686_v0  ;;  %214 = vmatprep.mubr.f32.mxu1 %v686_v0  ;;  %v41_v3 = vld [vmem:[#allocation2 + $0x28] sm:$0xff]  ;;  %v43_v6 = vld [vmem:[#allocation2 + $0x38] sm:$0xff]  ;;  %v36_v7 = vld [vmem:[#allocation2] sm:$0xff]  ;;  %vm66_vm0 = vcmask 1043456   ;;  %vm62_vm1 = vcmask 293888   ;;  %vm357_vm2 = vcmask 1041408  }
  0x15   :  { %634 = vset.pattern.permute.xlu0 %v687_v1  ;;  %v609_v5 = vpack.c.bf16 %v41_v3, %v37_v2  ;;  %v40_v8 = vld [vmem:[#allocation2 + $0x20] sm:$0xff]  ;;  %v617_v9 = vpack.c.bf16 %v43_v6, %v39_v4  ;;  %v38_v11 = vld [vmem:[#allocation2 + $0x10] sm:$0xff]  ;;  %v45_v13 = vld [vmem:[#allocation2 + $0x48] sm:$0xff]  ;;  %v230_v33 = vshrl.u32 %v229_v32, 7  ;;  %v424_v34 = vand.u32 127, %v229_v32  ;;  %s691_s11 = smov [#allocation5]  }
  0x16   :  { %v611_v10 = vpack.c.bf16 %v40_v8, %v36_v7  ;;  %v42_v12 = vld [vmem:[#allocation2 + $0x30] sm:$0xff]  ;;  %v49_v15 = vld [vmem:[#allocation2 + $0x68] sm:$0xff]  ;;  %v47_v16 = vld [vmem:[#allocation2 + $0x58] sm:$0xff]  ;;  %v688_v36 = vmov 1983009808   ;;  %vm690_vm3 = vmmov 0  }
  0x17   :  { %610 = vmatprep.subr.bf16.mxu0 %v609_v5  ;;  %v619_v14 = vpack.c.bf16 %v42_v12, %v38_v11  ;;  %v51_v17 = vld [vmem:[#allocation2 + $0x78] sm:$0xff]  ;;  %618 = vmatprep.subr.bf16.mxu1 %v617_v9  ;;  %v613_v18 = vpack.c.bf16 %v49_v15, %v45_v13  ;;  %v44_v20 = vld [vmem:[#allocation2 + $0x40] sm:$0xff]  ;;  %v46_v22 = vld [vmem:[#allocation2 + $0x50] sm:$0xff]  ;;  %v743_v35 = vsub.s32 %v424_v34, %v230_v33  ;;  %v227_v37 = vunpack.c.l.s4 %v688_v36  ;;  %s585_s12 = sshll.u32 %s691_s11, 4  ;;  %s586_s12 = int_to_ptr.vmem [resolvable:$true] %s585_s12 }
  0x18   :  { %612 = vmatpush1.bf16.msra.mxu0 %v611_v10  ;;  %v621_v19 = vpack.c.bf16 %v51_v17, %v47_v16  ;;  %v48_v21 = vld [vmem:[#allocation2 + $0x60] sm:$0xff]  ;;  %v50_v24 = vld [vmem:[#allocation2 + $0x70] sm:$0xff]  ;;  %v53_v26 = vld [vmem:[#allocation2 + $0x88] sm:$0xf]  ;;  %v689_v39 = vmov 1934713408   ;;  %p662_p9 = scmp.lt.s32.totalorder %s586_s12, %s586_s12 }
  0x19   :  { %620 = vmatpush1.bf16.msra.mxu1 %v619_v14  ;;  %v615_v23 = vpack.c.bf16 %v48_v21, %v44_v20  ;;  %614 = vmatprep.subr.bf16.mxu0 %v613_v18  ;;  %v623_v25 = vpack.c.bf16 %v50_v24, %v46_v22  ;;  %v55_v27 = vld [vmem:[#allocation2 + $0x98] sm:$0xf]  ;;  %v56_v28 = vld [vmem:[%s802_s2] sm:$0xff]  ;;  %v54_v30 = vld [vmem:[#allocation2 + $0x90] sm:$0xf]  ;;  %v228_v38 = vunpack.c.0.s8 %v227_v37  ;;  %v258_v40 = vunpack.c.l.s4 %v689_v39  ;;  %s657_s13 = scalar_lea.vmem %s586_s12, 32 }
  0x1a   :  { %622 = vmatprep.subr.bf16.mxu1 %v621_v19  ;;  %59 = vperm.xlu0 %634, %v56_v28   ;;  %v52_v29 = vld [vmem:[#allocation2 + $0x80] sm:$0xf]  ;;  %vm457_vm4 = vcmask 1041409   ;;  %vm459_vm5 = vcmask 1042434   ;;  %vm461_vm6 = vcmask 1043459   ;;  %vm463_vm7 = vcmask 1044484   ;;  %p658_p8 = scmp.ne.s32.totalorder %s586_s12, %s657_s13  ;;  %p663_p10 = scmp.lt.s32.totalorder %s657_s13, %s657_s13 }
  0x1b   :  { %v35_v31 = vld [vmem:[%s801_s1] sm:$0xff]  ;;  %v231_v44 = vsub.s32 %v228_v38, %v230_v33  ;;  %v259_v47 = vunpack.c.0.s8 %v258_v40  ;;  %vm465_vm8 = vcmask 1045509   ;;  %vm467_vm9 = vcmask 1046534  }
  0x1c   :  { %616 = vmatpush1.bf16.msra.mxu0 %v615_v23  ;;  %vm469_vm10 = vcmask 1047559   ;;  %vm504_vm11 = vcmask 64512   ;;  %p664_p11 = por %p663_p10, %p662_p9 }
  0x1d   :  { %624 = vmatpush1.bf16.msra.mxu1 %v623_v25  ;;  %594 = vmatprep.subr.msk.mxu0 %vm66_vm0, %v53_v26  ;;  %v262_v58 = vsub.s32 %v259_v47, %v230_v33 }
  0x1e   :  { %597 = vmatprep.subr.msk.mxu1 %vm66_vm0, %v55_v27  ;;  %p665_p12 = pnand %p664_p11, %p658_p8 }
  0x20   :  { %595 = vmatpush1.msk.msra.mxu0 %vm66_vm0, %v52_v29 }
  0x21   :  { %598 = vmatpush1.msk.msra.mxu1 %vm66_vm0, %v54_v30  ;;  %596 = vmatmul.mubr.msk.f32.vlgmr.msra.gmra.mrb[0].mxu0 %vm62_vm1, %v35_v31 }
  0x22   :  { %599 = vmatmul.mubr.msk.f32.vlgmr.msra.gmra.mrb[0].mxu1 %vm62_vm1, %v35_v31  ;;  %604 = vmatprep.subr.mxu0 %v686_v0 }
  0x23   :  { %606 = vmatprep.mubr.msk.f32.mxu0 %vm690_vm3, %v686_v0 }
  0x99   :  { %v60_v41 = vpop.permute.xlu0 %59 }
  0xf4   :  { %v145_v42 = vpop.f32.mrb[0].mxu0 }
  0xf5   :  { %v146_v43 = vadd.f32 %v145_v42, %v60_v41  ;;  %v216_v45 = vpop.f32.mrb[0].mxu1  ;;  %v147_v46 = vpop.f32.mrb[1].mxu0 }
  0xf6   :  { %v217_v48 = vadd.f32 %v216_v45, %v60_v41  ;;  %v148_v49 = vadd.f32 %v147_v46, %v60_v41  ;;  %v218_v50 = vpop.f32.mrb[1].mxu1 }
  0xf7   :  { %v221_v51 = vmax.f32 %v146_v43, 0.0  ;;  %v219_v52 = vadd.f32 %v218_v50, %v60_v41 }
  0xf8   :  { %v223_v53 = vmax.f32 %v217_v48, 0.0  ;;  %v222_v54 = vmax.f32 %v148_v49, 0.0 }
  0xf9   :  { %v225_v55 = vcombine.high %v221_v51, %v686_v0  ;;  %v232_v56 = vrot.slane %v221_v51, %v231_v44  ;;  %v224_v57 = vmax.f32 %v219_v52, 0.0 }
  0xfa   :  { %v240_v59 = vcombine.high %v223_v53, %v686_v0  ;;  %v247_v60 = vrot.slane %v223_v53, %v231_v44  ;;  %v291_v61 = vcombine.high %v222_v54, %v686_v0  ;;  %v298_v62 = vrot.slane %v222_v54, %v231_v44 }
  0xfb   :  { %v239_v63 = vrot.slane %v225_v55, %v231_v44  ;;  %v306_v1 = vcombine.high %v224_v57, %v686_v0  ;;  %v313_v2 = vrot.slane %v224_v57, %v231_v44  ;;  %v407_v55 = vld [vmem:[%s803_s3] sm:$0xff] }
  0xfc   :  { %v254_v3 = vrot.slane %v240_v59, %v231_v44  ;;  %v255_v4 = vcombine.low %v232_v56, %v247_v60  ;;  %v305_v5 = vrot.slane %v291_v61, %v231_v44  ;;  %v256_v6 = vcombine.high %v232_v56, %v247_v60  ;;  %605 = vmatpush3.msra.mxu0 %v407_v55 }
  0xfd   :  { %v320_v7 = vrot.slane %v306_v1, %v231_v44  ;;  %v321_v8 = vcombine.low %v298_v62, %v313_v2  ;;  %v322_v9 = vcombine.high %v298_v62, %v313_v2 }
  0xfe   :  { %v270_v10 = vrot.slane %v256_v6, %v262_v58  ;;  %v263_v11 = vrot.slane %v255_v4, %v262_v58  ;;  %v271_v12 = vcombine.low %v239_v63, %v254_v3  ;;  %v272_v13 = vcombine.high %v239_v63, %v254_v3 }
  0xff   :  { %v336_v14 = vrot.slane %v322_v9, %v262_v58  ;;  %v329_v15 = vrot.slane %v321_v8, %v262_v58  ;;  %v337_v16 = vcombine.low %v305_v5, %v320_v7  ;;  %v338_v17 = vcombine.high %v305_v5, %v320_v7 }
 0x100   :  { %v368_v18 = vsel %vm357_vm2, %v270_v10, 0.0  ;;  %v358_v19 = vsel %vm357_vm2, %v263_v11, 0.0  ;;  %v287_v20 = vcombine.high %v263_v11, %v686_v0  ;;  %v288_v21 = vcombine.high %v270_v10, %v686_v0 }
 0x101   :  { %v369_v22 = vsel %vm357_vm2, %v336_v14, 0.0  ;;  %v359_v23 = vsel %vm357_vm2, %v329_v15, 0.0  ;;  %v353_v24 = vcombine.high %v329_v15, %v686_v0  ;;  %v354_v25 = vcombine.high %v336_v14, %v686_v0 }
 0x102   :  { %v370_v26 = vadd.f32 %v369_v22, %v368_v18  ;;  %v360_v27 = vadd.f32 %v359_v23, %v358_v19  ;;  %v363_v28 = vsel %vm357_vm2, %v287_v20, 0.0  ;;  %v373_v29 = vsel %vm357_vm2, %v288_v21, 0.0 }
 0x103   :  { %v364_v30 = vsel %vm357_vm2, %v353_v24, 0.0  ;;  %v374_v31 = vsel %vm357_vm2, %v354_v25, 0.0  ;;  %v279_v32 = vrot.slane %v271_v12, %v262_v58  ;;  %v345_v33 = vrot.slane %v337_v16, %v262_v58  ;;  %v600_v24 = vld [vmem:[%s804_s4] ss:$0 sm:$0xff] }
 0x104   :  { %371 = vadd.xlane.f32.xlu1 %v370_v26  ;;  %361 = vadd.xlane.f32.xlu0 %v360_v27  ;;  %v365_v34 = vadd.f32 %v364_v30, %v363_v28  ;;  %v375_v36 = vadd.f32 %v374_v31, %v373_v29  ;;  %v286_v37 = vrot.slane %v272_v13, %v262_v58 }
 0x105   :  { %v378_v38 = vsel %vm357_vm2, %v279_v32, 0.0  ;;  %v379_v39 = vsel %vm357_vm2, %v345_v33, 0.0  ;;  %v352_v40 = vrot.slane %v338_v17, %v262_v58  ;;  %v289_v41 = vcombine.high %v279_v32, %v686_v0 }
 0x106   :  { %v380_v42 = vadd.f32 %v379_v39, %v378_v38  ;;  %v388_v43 = vsel %vm357_vm2, %v286_v37, 0.0  ;;  %v355_v44 = vcombine.high %v345_v33, %v686_v0  ;;  %v290_v45 = vcombine.high %v286_v37, %v686_v0 }
 0x107   :  { %v389_v46 = vsel %vm357_vm2, %v352_v40, 0.0  ;;  %v383_v47 = vsel %vm357_vm2, %v289_v41, 0.0  ;;  %v356_v48 = vcombine.high %v352_v40, %v686_v0 }
 0x108   :  { %366 = vadd.xlane.f32.xlu1 %v365_v34  ;;  %v390_v49 = vadd.f32 %v389_v46, %v388_v43  ;;  %v384_v50 = vsel %vm357_vm2, %v355_v44, 0.0  ;;  %v393_v51 = vsel %vm357_vm2, %v290_v45, 0.0 }
 0x109   :  { %v385_v52 = vadd.f32 %v384_v50, %v383_v47  ;;  %v394_v53 = vsel %vm357_vm2, %v356_v48, 0.0 }
 0x10a   :  { %v395_v54 = vadd.f32 %v394_v53, %v393_v51 }
 0x10c   :  { %376 = vadd.xlane.f32.xlu1 %v375_v36 }
 0x110   :  { %381 = vadd.xlane.f32.xlu1 %v380_v42 }
 0x114   :  { %391 = vadd.xlane.f32.xlu1 %v390_v49 }
 0x118   :  { %386 = vadd.xlane.f32.xlu1 %v385_v52 }
 0x11c   :  { %396 = vadd.xlane.f32.xlu1 %v395_v54 }
 0x191   :  { %v372_v56 = vpop.xlane.xlu1 %371  ;;  %v362_v59 = vpop.xlane.xlu0 %361 }
 0x192   :  { %v399_v62 = vmul.f32 0.00390625, %v362_v59  ;;  %v401_v2 = vmul.f32 0.00390625, %v372_v56 }
 0x194   :  { %v428_v5 = vrot.slane %v399_v62, %v743_v35  ;;  %v436_v7 = vrot.slane %v401_v2, %v743_v35 }
 0x195   :  { %v367_v57 = vpop.xlane.xlu1 %366 }
 0x196   :  { %v400_v60 = vmul.f32 0.00390625, %v367_v57 }
 0x198   :  { %v432_v63 = vrot.slane %v400_v60, %v743_v35 }
 0x199   :  { %v377_v58 = vpop.xlane.xlu1 %376 }
 0x19a   :  { %v402_v1 = vmul.f32 0.00390625, %v377_v58  ;;  %v458_v6 = vsel %vm457_vm4, %v432_v63, %v428_v5 }
 0x19b   :  { %v460_v11 = vsel %vm459_vm5, %v436_v7, %v458_v6 }
 0x19c   :  { %v440_v0 = vrot.slane %v402_v1, %v743_v35 }
 0x19d   :  { %v382_v61 = vpop.xlane.xlu1 %381 }
 0x19e   :  { %v403_v3 = vmul.f32 0.00390625, %v382_v61  ;;  %v462_v13 = vsel %vm461_vm6, %v440_v0, %v460_v11 }
 0x1a0   :  { %v444_v8 = vrot.slane %v403_v3, %v743_v35 }
 0x1a1   :  { %v392_v4 = vpop.xlane.xlu1 %391 }
 0x1a2   :  { %v405_v12 = vmul.f32 0.00390625, %v392_v4  ;;  %v464_v15 = vsel %vm463_vm7, %v444_v8, %v462_v13 }
 0x1a4   :  { %v452_v19 = vrot.slane %v405_v12, %v743_v35 }
 0x1a5   :  { %v387_v9 = vpop.xlane.xlu1 %386 }
 0x1a6   :  { %v404_v10 = vmul.f32 0.00390625, %v387_v9 }
 0x1a8   :  { %v448_v14 = vrot.slane %v404_v10, %v743_v35 }
 0x1a9   :  { %v397_v16 = vpop.xlane.xlu1 %396 }
 0x1aa   :  { %v406_v17 = vmul.f32 0.00390625, %v397_v16  ;;  %v466_v18 = vsel %vm465_vm8, %v448_v14, %v464_v15 }
 0x1ab   :  { %v468_v21 = vsel %vm467_vm9, %v452_v19, %v466_v18 }
 0x1ac   :  { %v456_v20 = vrot.slane %v406_v17, %v743_v35 }
 0x1ae   :  { %v470_v22 = vsel %vm469_vm10, %v456_v20, %v468_v21 }
 0x1af   :  { %472 = vxpose.xlu1.b32.start.end [1/1] (short) (narrow) %v470_v22, 8 }
 0x22f   :  { %v488_v23 = vpop.trf.xlu1 }
 0x230   :  { %607 = vmatmul.mubr.msk.f32.vlgmr.msra.gmra.mrb[2].mxu0 %vm504_vm11, %v488_v23 }
 0x303   :  { %v574_v25 = vpop.f32.mrb[2].mxu0 }
 0x304   :  { %v575_v26 = vadd.f32 %v600_v24, %v574_v25  ;;  %v608_v27 = vpop.f32.mrb[3].mxu0 }
 0x306   :  { %578 = vst [vmem:[#allocation5] sm:$0x3] %v575_v26 }
 0x307   :  { %668 = shalt.err (!%p665_p12)
}
 0x308   :  { %s669_s16 = scalar_lea.hbm %s805_s5, 32 }
 0x309   :  { %p670_p13 = scmp.ne.s32.totalorder %s805_s5, %s669_s16  ;;  %p673_p0 = scmp.lt.u32.totalorder %s669_s16, %s805_s5 }
 0x30b   :  { %p675_p1 = pnand %p673_p0, %p670_p13 }
 0x30d   :  { %678 = shalt.err (!%p675_p1)
}
 0x30e   :  { %588 = dma.vmem_to_hbm [thread:$0]  %s586_s12, 32, %s805_s5, [#allocation4]  }
 0x30f   :  { %681 = dma.done.wait [#allocation4], 32  }
 0x310   :  { %682 = vsyncadd [#allocation4], 4294967264 }
 0x311   :  { %592 = vsyncpa [#allocation3], 1 }
 0x312   :  { %593 = vsyncpa [#allocation4], 1 }

</bundles_post_ra>
